<compile_context>
chip_gen: v6e
topology: v6e:2x2x1
jax: 0.10.0
libtpu: 0.0.40
codegen_flags: <defaults>
</compile_context>

<pallas_src>
from functools import partial

import jax
import jax.numpy as jnp
from jax.experimental import pallas as pl
from jax.experimental.pallas import tpu as pltpu


# ---------------------------------------------------------------------------
# Pallas kernel: out[r, w] = scale * x[r, w] + shift   (pure HBM stream)
# ---------------------------------------------------------------------------
def _fused_affine_kernel(ss_ref, x_ref, o_ref):
    # ss_ref is a (2,) SMEM operand: [scale, shift]
    o_ref[...] = x_ref[...] * ss_ref[0] + ss_ref[1]


def fused_affine_pallas(x2d, scale_shift, *, target_block_bytes=2 * 1024 * 1024):
    """One elementwise pass over a lane-dense (rows, W) slab of the embedding."""
    R, W = x2d.shape
    row_bytes = W * x2d.dtype.itemsize

    # Rows per tile so one block is ~target_block_bytes; multiple of 8 (sublane)
    # unless the whole array fits in one block anyway.
    rows_per_tile = max(8, (target_block_bytes // row_bytes) // 8 * 8)
    tile = R if R <= rows_per_tile else rows_per_tile
    grid = (pl.cdiv(R, tile),)

    return pl.pallas_call(
        _fused_affine_kernel,
        out_shape=jax.ShapeDtypeStruct((R, W), x2d.dtype),
        grid=grid,
        in_specs=[
            pl.BlockSpec(memory_space=pltpu.MemorySpace.SMEM),   # (2,) scale/shift
            pl.BlockSpec((tile, W), lambda i: (i, 0)),           # embed rows
        ],
        out_specs=pl.BlockSpec((tile, W), lambda i: (i, 0)),
        # Alias the embed slab to the output.  This only saves the second HBM
        # allocation when the buffer is dead/donated at the jit boundary;
        # otherwise XLA inserts a defensive copy (still correct).
        input_output_aliases={1: 0},
        compiler_params=pltpu.CompilerParams(
            dimension_semantics=("parallel",),   # rows shard across v7x TCs
            vmem_limit_bytes=32 * 1024 * 1024,
        ),
    )(scale_shift, x2d)


# ---------------------------------------------------------------------------
# Scalar-side glue (runs inside the same jit, fused by XLA)
# ---------------------------------------------------------------------------
def _stage_scalar_params(key, weights_param, temperature, alphas, betas, dtype):
    """Effective affine (scale, shift) of one SubPolicyStage (training branch).

        e_out = sum(sampled_op) * (alpha[idx] * e + beta[idx]) = scale*e + shift
    """
    K = weights_param.shape[0]
    kg, ki = jax.random.split(key)

    # F.gumbel_softmax(self._weights, tau=temperature, hard=True)
    u = jax.random.uniform(kg, (K,), minval=1e-6, maxval=1.0 - 1e-6)
    gumbel = -jnp.log(-jnp.log(u))
    soft = jax.nn.softmax((weights_param + gumbel) / temperature)
    sampled_op = jax.nn.one_hot(jnp.argmax(soft), K, dtype=dtype)   # hard one-hot
    w_total = jnp.sum(sampled_op)   # == 1.0 (one-hot); kept for semantic fidelity

    # _weights initialized to ones -> mean == 1 -> random-index branch.
    # TODO(synk): once weights are trained the PyTorch module switches to the
    #             argmax-of-one-hot branch; not modelled here.
    sampled_idx = jax.random.randint(ki, (1,), 0, K, dtype=jnp.int32)[0]

    scale = w_total * alphas[sampled_idx]
    shift = w_total * betas[sampled_idx]
    return scale, shift


def _pick_lane_width(n_elems, h):
    """Widest lane width in {1024,512,256,128} dividing n_elems (fallback: h)."""
    for w in (1024, 512, 256, 128):
        if n_elems % w == 0:
            return w
    return h


@partial(jax.jit, static_argnames=("temperature", "use_pallas"))
def sub_policy_forward(stage_keys, stage_weights, temperature,
                       stage_alphas, stage_betas, inp, embed, *,
                       use_pallas=True):
    """SubPolicy.forward: compose per-stage affines, one fused elementwise pass."""
    B, S, H = embed.shape
    N = B * S * H

    # Compose stage_2 o stage_1 on the scalar side:  e -> scale*e + shift
    scale_acc = jnp.asarray(1.0, dtype=embed.dtype)
    shift_acc = jnp.asarray(0.0, dtype=embed.dtype)
    for key, w, a, b in zip(stage_keys, stage_weights, stage_alphas, stage_betas):
        s, t = _stage_scalar_params(key, w, temperature, a, b, embed.dtype)
        scale_acc = s * scale_acc
        shift_acc = s * shift_acc + t

    if use_pallas:
        W = _pick_lane_width(N, H)                 # lane-dense slab width
        x2d = embed.reshape(N // W, W)
        scale_shift = jnp.stack([scale_acc, shift_acc])
        out2d = fused_affine_pallas(x2d, scale_shift)
        out_embed = out2d.reshape(B, S, H)
    else:
        # Small-input fast path: plain XLA fusion; avoids pallas_call fixed cost.
        out_embed = scale_acc * embed + shift_acc

    # synthetic operations leave `input` unchanged
    return inp, out_embed


# ---------------------------------------------------------------------------
if __name__ == "__main__":
    B, S, H = 2, 8, 128      # batch=2, seq=8, hidden=128 (lane-aligned)
    K = 4                    # operations per stage
    OPC = 2                  # operation_count -> number of stages

    key = jax.random.PRNGKey(0)
    k_emb, k_in, *stage_keys = jax.random.split(key, 2 + OPC)
    stage_keys = list(stage_keys)

    embed = jax.random.normal(k_emb, (B, S, H), dtype=jnp.float32)
    inp = jax.random.randint(k_in, (B, S), 0, 1000, dtype=jnp.int32)

    temperature = 0.5
    # per-stage _weights = nn.Parameter(torch.ones(K))
    stage_weights = [jnp.ones((K,), jnp.float32) for _ in range(OPC)]
    # deterministic synthetic op parameters (stand-ins for the operations ModuleList)
    stage_alphas = [jnp.linspace(0.5, 2.0, K).astype(jnp.float32),
                    jnp.linspace(0.8, 1.2, K).astype(jnp.float32)]
    stage_betas = [jnp.linspace(-0.1, 0.1, K).astype(jnp.float32),
                   jnp.linspace(0.0, 0.3, K).astype(jnp.float32)]

    # Pallas path (forced so the kernel is exercised at this toy size).
    out_inp, out_embed = sub_policy_forward(stage_keys, stage_weights, temperature,
                                            stage_alphas, stage_betas, inp, embed,
                                            use_pallas=True)
    jax.block_until_ready(out_embed)

    # Small-input fast path (plain XLA) must agree with the Pallas path.
    _, out_embed_fast = sub_policy_forward(stage_keys, stage_weights, temperature,
                                           stage_alphas, stage_betas, inp, embed,
                                           use_pallas=False)
    jax.block_until_ready(out_embed_fast)

    # pure-JAX reference of the same forward (same keys, same branch structure,
    # applied stage by stage exactly like the PyTorch module)
    def ref_stage(kk, w, a, b, x, e):
        kg, ki = jax.random.split(kk)
        u = jax.random.uniform(kg, (K,), minval=1e-6, maxval=1.0 - 1e-6)
        g = -jnp.log(-jnp.log(u))
        soft = jax.nn.softmax((w + g) / temperature)
        one_hot = jax.nn.one_hot(jnp.argmax(soft), K, dtype=e.dtype)
        idx = jax.random.randint(ki, (1,), 0, K, dtype=jnp.int32)[0]
        op_e = e * a[idx] + b[idx]
        return x, (op_e[None] * one_hot[:, None, None, None]).sum(0)

    rx, re = inp, embed
    for kk, w, a, b in zip(stage_keys, stage_weights, stage_alphas, stage_betas):
        rx, re = ref_stage(kk, w, a, b, rx, re)

    assert jnp.allclose(out_embed, re, atol=1e-5, rtol=1e-5), "pallas mismatch vs reference"
    assert jnp.allclose(out_embed_fast, re, atol=1e-5, rtol=1e-5), "fast path mismatch"
    assert jnp.array_equal(out_inp, rx), "input passthrough mismatch"
    print("KERNEL_OK")
</pallas_src>

<mosaic_0001>
module attributes {stable_mosaic.version = 11 : i64} {
  func.func @_fused_affine_kernel(%arg0: i32, %arg1: memref<2xf32, #tpu.memory_space<smem>>, %arg2: memref<2x1024xf32, #tpu.memory_space<vmem>>, %arg3: memref<2x1024xf32, #tpu.memory_space<vmem>>) attributes {dimension_semantics = [#tpu.dimension_semantics<parallel>], iteration_bounds = array<i64: 1>, scalar_prefetch = 0 : i64, scratch_operands = 0 : i64, tpu.core_type = #tpu.core_type<tc>, window_params = [{transform_indices = @transform_0, window_bounds = array<i64: 2>}, {transform_indices = @transform_1, window_bounds = array<i64: 2, 1024>}, {transform_indices = @transform_2, window_bounds = array<i64: 2, 1024>}]} {
    %c0 = arith.constant 0 : index
    %c0_0 = arith.constant 0 : index
    %0 = vector.load %arg2[%c0, %c0_0] : memref<2x1024xf32, #tpu.memory_space<vmem>>, vector<2x1024xf32>
    %c0_1 = arith.constant 0 : index
    %1 = memref.load %arg1[%c0_1] : memref<2xf32, #tpu.memory_space<smem>>
    %2 = vector.broadcast %1 : f32 to vector<2x1024xf32>
    %3 = arith.mulf %0, %2 : vector<2x1024xf32>
    %c1 = arith.constant 1 : index
    %4 = memref.load %arg1[%c1] : memref<2xf32, #tpu.memory_space<smem>>
    %5 = vector.broadcast %4 : f32 to vector<2x1024xf32>
    %6 = arith.addf %3, %5 : vector<2x1024xf32>
    %c0_2 = arith.constant 0 : index
    %c0_3 = arith.constant 0 : index
    %7 = vector.load %arg3[%c0_2, %c0_3] : memref<2x1024xf32, #tpu.memory_space<vmem>>, vector<2x1024xf32>
    tpu.vector_store %arg3[%c0_2, %c0_3], %6 {strides = array<i32>} : memref<2x1024xf32, #tpu.memory_space<vmem>>, vector<2x1024xf32>,
    return
  }
  func.func @transform_0(%arg0: i32) -> i32 {
    %c0_i32 = arith.constant 0 : i32
    %c0_i32_0 = arith.constant 0 : i32
    return %c0_i32 : i32
  }
  func.func @transform_1(%arg0: i32) -> (i32, i32) {
    %c0_i32 = arith.constant 0 : i32
    %c0_i32_0 = arith.constant 0 : i32
    return %arg0, %c0_i32 : i32, i32
  }
  func.func @transform_2(%arg0: i32) -> (i32, i32) {
    %c0_i32 = arith.constant 0 : i32
    %c0_i32_0 = arith.constant 0 : i32
    return %arg0, %c0_i32 : i32, i32
  }
}

</mosaic_0001>

<bundles_post_ra>
// kernel: sub_policy_forward.1
= control target key start
LH: loop header
LB: loop body
LE: loop exit
PB: predicated region body
PF: predicated region fallthrough
CT: control target
= control target key end

     0   :  { %7 = vsyncpa [#allocation3], 0  ;;  %s88_s0 = inlined_call_operand.vmem [shape: f32[2], index: 0, kind: input, shape index: {}]   ;;  %s89_s1 = inlined_call_operand.vmem [shape: f32[2,1024], index: 1, kind: input, shape index: {}, may-alias: {1,2}]   ;;  %s90_s2 = inlined_call_operand.vmem [shape: f32[2,1024], index: 2, kind: output, shape index: {}, may-alias: {1,2}]  }
   0x1   :  { %s14_s11 = sshll.u32 %s88_s0, 4  ;;  %s15_s11 = int_to_ptr.vmem [resolvable:$true] %s14_s11 }
   0x2   :  { %s43_s12 = scalar_lea.vmem %s15_s11, 16  ;;  %p48_p1 = scmp.lt.s32.totalorder %s15_s11, %s15_s11 }
   0x3   :  { %p44_p0 = scmp.ne.s32.totalorder %s15_s11, %s43_s12  ;;  %p49_p2 = scmp.lt.s32.totalorder %s43_s12, %s43_s12 }
   0x5   :  { %p50_p3 = por %p49_p2, %p48_p1 }
   0x7   :  { %p51_p4 = pnand %p50_p3, %p44_p0 }
   0x9   :  { %54 = shalt.err (!%p51_p4)
}
   0xa   :  { %s57_s13 = smov [#allocation2]  }
   0xb   :  { %17 = dma.vmem_to_smem %s15_s11, 16, %s57_s13, [#allocation3]  }
   0xc   :  { %55 = dma.done.wait [#allocation3], 16  }
   0xd   :  { %56 = vsyncadd [#allocation3], 4294967280 }
   0xe   :  { %23 = sfence }
   0xf   :  { %s26_s14 = sld [smem:[#allocation2]]  ;;  %v24_v0 = vld [vmem:[%s89_s1] sm:$0xff]  ;;  %v25_v1 = vld [vmem:[%s89_s1 + $0x8] sm:$0xff] }
  0x10   :  { %s41_s15 = sld [smem:[#allocation2 + $0x1]] }
  0x15   :  { %v27_v2 = vstv %s26_s14 }
  0x16   :  { %v28_v3 = vmul.f32 %v27_v2, %v24_v0  ;;  %v31_v4 = vstv %s41_s15  ;;  %v29_v5 = vmul.f32 %v27_v2, %v25_v1 }
  0x18   :  { %v32_v6 = vadd.f32 %v31_v4, %v28_v3  ;;  %v33_v7 = vadd.f32 %v31_v4, %v29_v5 }
  0x1a   :  { %34 = vst [vmem:[%s90_s2] sm:$0xff] %v32_v6  ;;  %35 = vst [vmem:[%s90_s2 + $0x8] sm:$0xff] %v33_v7 }
  0x1b   :  { %40 = vsyncpa [#allocation3], 1 }

</bundles_post_ra>
